<compile_context>
chip_gen: v7x
topology: tpu7x:2x2x1
jax: 0.10.0
libtpu: 0.0.40
codegen_flags: <defaults>
</compile_context>

<pallas_src>
import jax
import jax.numpy as jnp
from jax.experimental import pallas as pl
from jax.experimental.pallas import tpu as pltpu


_GRAN = 512                               # padding granularity for node / edge axes
_FALLBACK_VMEM_LIMIT = 48 * 1024 * 1024   # safe on v7x (64 MiB physical VMEM)


def _round_up(x, m):
    return ((x + m - 1) // m) * m


def _pad2d(x, rows, cols):
    r, c = x.shape
    if r == rows and c == cols:
        return x
    return jnp.pad(x, ((0, rows - r), (0, cols - c)))


def _pick_tile(npad, target):
    t = min(target, npad)
    while t > 8 and npad % t:
        t //= 2
    return t if npad % t == 0 else 8


def _row_contract_tiles(n, *, tm_target=1024, tk_target=1024):
    """Pad an axis used both as a row axis (tile tm) and a contraction axis (tile tk)
    to a multiple of _GRAN, then pick tiles that divide the padded size.  Keeps >= 2
    row tiles whenever possible so the 'parallel' row grid axis can megacore-shard."""
    npad = _round_up(max(n, 1), _GRAN)
    tk = _pick_tile(npad, tk_target)
    tm = _pick_tile(npad, min(tm_target, max(npad // 2, 256)))
    return npad, tm, tk


def _vmem_limit_bytes():
    # Per-generation scoped-VMEM limit: ~3/4 of physical capacity, capped at 100 MiB,
    # never below the 48 MiB that is known-safe on v7x.
    try:
        cap = int(pltpu.get_tpu_info().vmem_capacity_bytes)
        return max(_FALLBACK_VMEM_LIMIT, min((cap * 3) // 4, 100 * 1024 * 1024))
    except Exception:
        return _FALLBACK_VMEM_LIMIT


# ---------------------------------------------------------------------------
# Kernel 1: input_edge_linear = relu(edge_feat @ W_e2l^T)
# F (num_edge_feats) is tiny and left unpadded: blocks use the full F extent.
# ---------------------------------------------------------------------------
def _edge_linear_kernel(x_ref, wt_ref, o_ref):
    acc = jnp.dot(x_ref[...], wt_ref[...], preferred_element_type=jnp.float32)
    o_ref[...] = jnp.maximum(acc, 0.0).astype(o_ref.dtype)


def edge_linear(x, wt, *, tm):
    M, K = x.shape          # K == num_edge_feats, unpadded (full-dim block)
    _, N = wt.shape
    return pl.pallas_call(
        _edge_linear_kernel,
        out_shape=jax.ShapeDtypeStruct((M, N), jnp.bfloat16),
        grid_spec=pltpu.PrefetchScalarGridSpec(
            num_scalar_prefetch=0,
            grid=(M // tm,),
            in_specs=[
                pl.BlockSpec((tm, K), lambda i: (i, 0)),
                pl.BlockSpec((K, N), lambda i: (0, 0)),
            ],
            out_specs=pl.BlockSpec((tm, N), lambda i: (i, 0)),
        ),
        compiler_params=pltpu.CompilerParams(
            dimension_semantics=("parallel",),
            vmem_limit_bytes=_vmem_limit_bytes(),
        ),
    )(x, wt)


# ---------------------------------------------------------------------------
# Kernel 2: e2n_pool = e2n_sp @ h_edge (K-tiled, f32 accumulator), fused with
#           static = e2n_pool @ W0^T  and  cur = relu(static).
# e2n_sp is streamed as int8 and widened to bf16 just before the dot.
# e2n_pool never touches HBM; the W0 matmul runs once, in f32.
# ---------------------------------------------------------------------------
def _pool_conv_kernel(e2n_ref, hedge_ref, w0t_ref, static_ref, cur_ref, acc_ref):
    k = pl.program_id(1)

    @pl.when(k == 0)
    def _():
        acc_ref[...] = jnp.zeros_like(acc_ref)

    acc_ref[...] += jnp.dot(e2n_ref[...].astype(jnp.bfloat16), hedge_ref[...],
                            preferred_element_type=jnp.float32)

    @pl.when(k == pl.num_programs(1) - 1)
    def _():
        static = jnp.dot(acc_ref[...], w0t_ref[...].astype(jnp.float32),
                         preferred_element_type=jnp.float32)
        static_ref[...] = static
        cur_ref[...] = jnp.maximum(static, 0.0).astype(cur_ref.dtype)


def pool_and_conv0(e2n, h_edge, w0t, *, tm, tk):
    Np, Ep = e2n.shape
    _, Lp = h_edge.shape
    return pl.pallas_call(
        _pool_conv_kernel,
        out_shape=(
            jax.ShapeDtypeStruct((Np, Lp), jnp.float32),   # static_message_conv
            jax.ShapeDtypeStruct((Np, Lp), jnp.bfloat16),  # relu(static_message_conv)
        ),
        grid_spec=pltpu.PrefetchScalarGridSpec(
            num_scalar_prefetch=0,
            grid=(Np // tm, Ep // tk),
            in_specs=[
                pl.BlockSpec((tm, tk), lambda i, k: (i, k)),   # e2n_sp tile (int8)
                pl.BlockSpec((tk, Lp), lambda i, k: (k, 0)),   # h_edge tile (bf16)
                pl.BlockSpec((Lp, Lp), lambda i, k: (0, 0)),   # W0^T (resident)
            ],
            out_specs=[
                pl.BlockSpec((tm, Lp), lambda i, k: (i, 0)),
                pl.BlockSpec((tm, Lp), lambda i, k: (i, 0)),
            ],
            scratch_shapes=[pltpu.VMEM((tm, Lp), jnp.float32)],
        ),
        compiler_params=pltpu.CompilerParams(
            dimension_semantics=("parallel", "arbitrary"),
            vmem_limit_bytes=_vmem_limit_bytes(),
        ),
    )(e2n, h_edge, w0t)


# ---------------------------------------------------------------------------
# Kernel 3: fused mean-field level:
#   cur <- relu(static + cur @ W1^T + (n2n_sp @ cur) @ W2^T)
# n2n_sp is streamed as int8 and widened to bf16 before the dot; the spmm is
# accumulated over the (last, "arbitrary") K grid axis in a VMEM f32 scratch;
# the merge + relu happens on the final K step, so n2n_pool never leaves VMEM.
# ---------------------------------------------------------------------------
def _level_kernel(static_ref, cur_row_ref, n2n_ref, cur_col_ref, w1t_ref, w2t_ref,
                  o_ref, acc_ref):
    k = pl.program_id(1)

    @pl.when(k == 0)
    def _():
        acc_ref[...] = jnp.zeros_like(acc_ref)

    acc_ref[...] += jnp.dot(n2n_ref[...].astype(jnp.bfloat16), cur_col_ref[...],
                            preferred_element_type=jnp.float32)

    @pl.when(k == pl.num_programs(1) - 1)
    def _():
        merged = (
            static_ref[...]
            + jnp.dot(cur_row_ref[...], w1t_ref[...],
                      preferred_element_type=jnp.float32)
            + jnp.dot(acc_ref[...], w2t_ref[...].astype(jnp.float32),
                      preferred_element_type=jnp.float32)
        )
        o_ref[...] = jnp.maximum(merged, 0.0).astype(o_ref.dtype)


def level_step(static, cur, n2n, w1t, w2t, *, tm, tk):
    Np, Lp = cur.shape
    return pl.pallas_call(
        _level_kernel,
        out_shape=jax.ShapeDtypeStruct((Np, Lp), jnp.bfloat16),
        grid_spec=pltpu.PrefetchScalarGridSpec(
            num_scalar_prefetch=0,
            grid=(Np // tm, Np // tk),
            in_specs=[
                pl.BlockSpec((tm, Lp), lambda i, k: (i, 0)),   # static (once per row tile)
                pl.BlockSpec((tm, Lp), lambda i, k: (i, 0)),   # cur, row operand for W1
                pl.BlockSpec((tm, tk), lambda i, k: (i, k)),   # n2n_sp tile (int8)
                pl.BlockSpec((tk, Lp), lambda i, k: (k, 0)),   # cur, spmm contraction operand
                pl.BlockSpec((Lp, Lp), lambda i, k: (0, 0)),   # W1^T (resident)
                pl.BlockSpec((Lp, Lp), lambda i, k: (0, 0)),   # W2^T (resident)
            ],
            out_specs=pl.BlockSpec((tm, Lp), lambda i, k: (i, 0)),
            scratch_shapes=[pltpu.VMEM((tm, Lp), jnp.float32)],
        ),
        compiler_params=pltpu.CompilerParams(
            dimension_semantics=("parallel", "arbitrary"),
            vmem_limit_bytes=_vmem_limit_bytes(),
        ),
    )(static, cur, n2n, cur, w1t, w2t)


# ---------------------------------------------------------------------------
# EmbedMeanField.mean_field forward (num_edge_feats > 0 path).
#   edge_feat : [E, F]   float32
#   n2n_sp    : [N, N]   dense 0/1 stand-in for the sparse node->node adjacency
#   e2n_sp    : [N, E]   dense 0/1 stand-in for the sparse edge->node incidence
#   params    : nn.Linear weights, stored [out_features, in_features], bias-free
# Zero padding is exact for this model: all Linears have bias=False, so padded
# rows/columns stay identically zero through every relu / spmm.
# ---------------------------------------------------------------------------
def embed_mean_field(edge_feat, n2n_sp, e2n_sp, params, max_lv):
    E, F = edge_feat.shape
    N = n2n_sp.shape[0]
    L = params["conv_params_0"].shape[0]

    Lp = _round_up(L, 128)                       # lane-dense latent dim
    Np, tm_n, tk_n = _row_contract_tiles(N)      # node axis: rows + spmm contraction
    Ep, tm_e, tk_e = _row_contract_tiles(E)      # edge axis: rows + pool contraction

    bf = jnp.bfloat16
    ef = _pad2d(edge_feat, Ep, F).astype(bf)          # F left unpadded
    e2n = _pad2d(e2n_sp, Np, Ep).astype(jnp.int8)     # 0/1: exact in int8
    n2n = _pad2d(n2n_sp, Np, Np).astype(jnp.int8)     # 0/1: exact in int8
    w_e2l_t = _pad2d(params["w_e2l"].T.astype(bf), F, Lp)
    w0_t = _pad2d(params["conv_params_0"].T.astype(bf), Lp, Lp)
    w1_t = _pad2d(params["conv_params_1"].T.astype(bf), Lp, Lp)
    w2_t = _pad2d(params["conv_params_2"].T.astype(bf), Lp, Lp)

    # input_edge_linear = relu(w_e2l(edge_feat))
    h_edge = edge_linear(ef, w_e2l_t, tm=tm_e)
    # e2n_pool = spmm(e2n_sp, h_edge); static = conv_params_0(e2n_pool); cur = relu(static)
    static, cur = pool_and_conv0(e2n, h_edge, w0_t, tm=tm_n, tk=tk_e)
    # mean-field levels: cur <- relu(static + conv1(cur) + conv2(spmm(n2n_sp, cur)))
    for _ in range(1, max_lv):
        cur = level_step(static, cur, n2n, w1_t, w2_t, tm=tm_n, tk=tk_n)

    return cur[:N, :L].astype(jnp.float32)


# Pure-JAX reference for verification (module semantics, f32 everywhere).
def embed_mean_field_ref(edge_feat, n2n_sp, e2n_sp, params, max_lv):
    relu = lambda x: jnp.maximum(x, 0.0)
    h_e = relu(edge_feat @ params["w_e2l"].T)
    e2n_pool = e2n_sp @ h_e
    static = e2n_pool @ params["conv_params_0"].T
    cur = relu(static)
    for _ in range(1, max_lv):
        pool = n2n_sp @ cur
        cur = relu(static + cur @ params["conv_params_1"].T + pool @ params["conv_params_2"].T)
    return cur


if __name__ == "__main__":
    # Small deterministic problem consistent with the module:
    #   N nodes, E edges, num_edge_feats=F, latent_dim=L, max_lv=3
    N_NODES, N_EDGES, NUM_EDGE_FEATS, LATENT_DIM, MAX_LV = 16, 32, 4, 32, 3

    key = jax.random.PRNGKey(0)
    k_ef, k_n2n, k_e2n, k_we, k_w0, k_w1, k_w2 = jax.random.split(key, 7)

    edge_feat = jax.random.normal(k_ef, (N_EDGES, NUM_EDGE_FEATS), dtype=jnp.float32)
    # Dense stand-ins for the sparse n2n / e2n matrices from S2VLIB.PrepareMeanField.
    n2n_sp = jax.random.bernoulli(k_n2n, 0.3, (N_NODES, N_NODES)).astype(jnp.float32)
    e2n_sp = jax.random.bernoulli(k_e2n, 0.2, (N_NODES, N_EDGES)).astype(jnp.float32)

    # Deterministic synthetic weights (nn.Linear stores [out_features, in_features]).
    params = {
        "w_e2l": 0.1 * jax.random.normal(k_we, (LATENT_DIM, NUM_EDGE_FEATS), dtype=jnp.float32),
        "conv_params_0": 0.1 * jax.random.normal(k_w0, (LATENT_DIM, LATENT_DIM), dtype=jnp.float32),
        "conv_params_1": 0.1 * jax.random.normal(k_w1, (LATENT_DIM, LATENT_DIM), dtype=jnp.float32),
        "conv_params_2": 0.1 * jax.random.normal(k_w2, (LATENT_DIM, LATENT_DIM), dtype=jnp.float32),
    }

    out = embed_mean_field(edge_feat, n2n_sp, e2n_sp, params, MAX_LV)
    out = jax.block_until_ready(out)
    assert out.shape == (N_NODES, LATENT_DIM)

    # Reference with bf16-quantized dense inputs / weights (same operand precision as
    # the kernels) but full-f32 arithmetic; tolerance accounts for bf16 activation
    # storage between fused stages.
    q = lambda x: x.astype(jnp.bfloat16).astype(jnp.float32)
    params_q = {k: q(v) for k, v in params.items()}
    ref = embed_mean_field_ref(q(edge_feat), n2n_sp, e2n_sp, params_q, MAX_LV)
    assert jnp.allclose(out, ref, atol=5e-2, rtol=5e-2), float(jnp.max(jnp.abs(out - ref)))

    print("KERNEL_OK")
</pallas_src>

<mosaic_0001>
module attributes {stable_mosaic.version = 11 : i64} {
  func.func @_edge_linear_kernel(%arg0: i32, %arg1: memref<256x4xbf16, #tpu.memory_space<vmem>>, %arg2: memref<4x128xbf16, #tpu.memory_space<vmem>>, %arg3: memref<256x128xbf16, #tpu.memory_space<vmem>>) attributes {dimension_semantics = [#tpu.dimension_semantics<parallel>], iteration_bounds = array<i64: 2>, scalar_prefetch = 0 : i64, scratch_operands = 0 : i64, tpu.core_type = #tpu.core_type<tc>, window_params = [{transform_indices = @transform_0, window_bounds = array<i64: 256, 4>}, {pipeline_mode = #tpu.pipeline_mode<synchronous>, transform_indices = @transform_1, window_bounds = array<i64: 4, 128>}, {transform_indices = @transform_2, window_bounds = array<i64: 256, 128>}]} {
    %c0 = arith.constant 0 : index
    %c0_0 = arith.constant 0 : index
    %0 = vector.load %arg1[%c0, %c0_0] : memref<256x4xbf16, #tpu.memory_space<vmem>>, vector<256x4xbf16>
    %c0_1 = arith.constant 0 : index
    %c0_2 = arith.constant 0 : index
    %1 = vector.load %arg2[%c0_1, %c0_2] : memref<4x128xbf16, #tpu.memory_space<vmem>>, vector<4x128xbf16>
    %cst = arith.constant dense<0.000000e+00> : vector<256x128xf32>
    %2 = tpu.matmul %0, %1, %cst {dimension_numbers = #tpu.dot_dimension_numbers<[1], [0], [0], [1], [0, 0, 1, 1], [], []>} : vector<256x4xbf16>, vector<4x128xbf16>, vector<256x128xf32> -> vector<256x128xf32>
    %cst_3 = arith.constant 0.000000e+00 : f32
    %3 = vector.broadcast %cst_3 : f32 to vector<256x128xf32>
    %4 = arith.maximumf %2, %3 : vector<256x128xf32>
    %5 = arith.truncf %4 : vector<256x128xf32> to vector<256x128xbf16>
    %c0_4 = arith.constant 0 : index
    %c0_5 = arith.constant 0 : index
    %6 = vector.load %arg3[%c0_4, %c0_5] : memref<256x128xbf16, #tpu.memory_space<vmem>>, vector<256x128xbf16>
    tpu.vector_store %arg3[%c0_4, %c0_5], %5 {strides = array<i32>} : memref<256x128xbf16, #tpu.memory_space<vmem>>, vector<256x128xbf16>,
    return
  }
  func.func @transform_0(%arg0: i32) -> (i32, i32) {
    %c0_i32 = arith.constant 0 : i32
    %c0_i32_0 = arith.constant 0 : i32
    return %arg0, %c0_i32 : i32, i32
  }
  func.func @transform_1(%arg0: i32) -> (i32, i32) {
    %c0_i32 = arith.constant 0 : i32
    %c0_i32_0 = arith.constant 0 : i32
    %c0_i32_1 = arith.constant 0 : i32
    return %c0_i32, %c0_i32_0 : i32, i32
  }
  func.func @transform_2(%arg0: i32) -> (i32, i32) {
    %c0_i32 = arith.constant 0 : i32
    %c0_i32_0 = arith.constant 0 : i32
    return %arg0, %c0_i32 : i32, i32
  }
}

</mosaic_0001>

<bundles_post_ra>
// kernel: tpu_custom_call.1
= control target key start
LH: loop header
LB: loop body
LE: loop exit
PB: predicated region body
PF: predicated region fallthrough
CT: control target
= control target key end

     0   :  { %7 = vsyncpa [#allocation3], 0  ;;  %s1301_s0 = inlined_call_operand.vmem [shape: bf16[512,4], index: 0, kind: input, shape index: {}]   ;;  %s1302_s1 = inlined_call_operand.vmem [shape: bf16[4,128], index: 1, kind: input, shape index: {}]   ;;  %s1303_s2 = inlined_call_operand.hbm [shape: bf16[512,128], index: 2, kind: output, shape index: {}]  }
   0x1   :  { %9 = vsyncpa [#allocation3 + $0x1], 0  ;;  %s1139_s9 = smov 0   ;;  %s1141_s10 = smov 0  }
   0x2   :  { %s1143_s11 = smov 0   ;;  %s1145_s12 = smov 0  }
   0x3 LB: > { %s1160_s13 = sadd.s32 4294967295, %s1119_s12   ;;  %s741_s14 = sadd.s32 4294967294, %s1119_s12   ;;  %s1119_s12 = sphi %s1145_s12, %s1309_s12   ;;  %s1115_s11 = sphi %s1143_s11, %s1308_s11   ;;  %s1111_s10 = sphi %s1141_s10, %s1307_s10   ;;  %s1107_s9 = sphi %s1139_s9, %s1306_s9  }
   0x4   : > { %s1164_s15 = sadd.s32 1, %s1119_s12   ;;  %s69_s16 = sadd.s32 1, %s1115_s11 }
   0x5   : > { %s66_s17 = ssub.s32 %s1119_s12, %s1164_s15  ;;  %p79_p0 = scmp.ne.s32.totalorder %s1115_s11, %s1111_s10 }
   0x6   : > { %p67_p1 = scmp.eq.s32.totalorder %s66_s17, 0  ;;  %p80_p2 = scmp.eq.s32.totalorder %s1160_s13, 1 }
   0x7   : > { %p85_p3 = scmp.ne.s32.totalorder %s1111_s10, %s1107_s9  ;;  %p86_p4 = scmp.eq.s32.totalorder %s741_s14, 1 }
   0x8   : > { %s1175_s18 = scalar_select %p67_p1, %s1115_s11, %s69_s16  }
   0x9   : > { %p1177_p5 = por %p80_p2, %p79_p0  ;;  %p1181_p6 = por %p86_p4, %p85_p3 }
   0xa   : > { %p744_p7 = scmp.ge.s32.totalorder %s1119_s12, 1  ;;  %p116_p8 = scmp.lt.s32.totalorder %s1119_s12, 3 }
   0xc   : > { %p117_p9 = pnand %p744_p7, %p116_p8 }
   0xd   : > { %v178_v0 = vld [vmem:[%s1302_s1] sm:$0x3] (!%p117_p9)  ;;  %vm308_vm0 = vcmask (!%p117_p9), 1041408   ;;  %s746_s23 = sshll.u32 (!%p117_p9), %s1160_s13, 5  ;;  %vm259_vm1 = vcmask (!%p117_p9), 31744   ;;  %s135_s28 = sand.u32 (!%p117_p9), 1, %s1111_s10  }
   0xe   : > { %120 = sbr.rel (%p117_p9) target bundleno = 285 (0x11d), region = 28  ;;  %998 = vmatprep.subr.msk.bf16.mxu0 (!%p117_p9), %vm308_vm0, %v178_v0  ;;  %999 = vmatprep.subr.msk.bf16.mxu1 (!%p117_p9), %vm308_vm0, %v178_v0  ;;  %v310_v1 = vsel (!%p117_p9), %vm308_vm0, %v178_v0, 0  ;;  %p139_p10 = scmp.lt.s32.totalorder (!%p117_p9), %s746_s23, 63 }
   0xf   : > { %963 = vmatpush3.bf16.msra.mxu0 (!%p117_p9), %v310_v1  ;;  %997 = vmatpush3.bf16.msra.mxu1 (!%p117_p9), %v310_v1  ;;  %s745_s29 = sshll.u32 (!%p117_p9), %s135_s28, 7  ;;  %s849_s3 = sshll.u32 (!%p117_p9), %s1160_s13, 11 }
  0x10   : > { %s1231_s30 = scalar_lea.vmem (!%p117_p9), [#allocation2], %s745_s29  ;;  %s1250_s7 = scalar_lea.hbm (!%p117_p9), %s1303_s2, %s849_s3 }
  0x11   : > { %s679_s4 = sshll.u32 (!%p117_p9), %s1231_s30, 4  ;;  %s1260_s8 = scalar_lea.sflag (!%p117_p9), [#allocation3], %s135_s28  ;;  %s1252_s4 = int_to_ptr.vmem [resolvable:$true] %s679_s4 }
  0x12   : > { %s1057_s13 = scalar_lea.vmem (!%p117_p9), %s1252_s4, 2048  ;;  %s1121_s14 = smov (!%p117_p9), [#allocation2]  }
  0x13   : > { %p1058_p11 = scmp.ne.s32.totalorder (!%p117_p9), %s1252_s4, %s1057_s13  ;;  %s1061_s16 = sshll.u32 (!%p117_p9), %s1121_s14, 4  ;;  %s1062_s16 = int_to_ptr.vmem [resolvable:$false] %s1061_s16 }
  0x14   : > { %s1063_s17 = scalar_lea.vmem (!%p117_p9), %s1062_s16, 4096  ;;  %p1064_p0 = scmp.lt.s32.totalorder (!%p117_p9), %s1252_s4, %s1062_s16 }
  0x15   : > { %s1311_s23 = smov (!%p139_p10, %s746_s23), 63  ;;  %p1059_p12 = pnand %p1058_p11, %p1177_p5 }
  0x16   : > { %s747_s24 = sshll.u32 %s1311_s23, 2  ;;  %p1065_p1 = scmp.lt.s32.totalorder %s1063_s17, %s1057_s13 }
  0x17   : > { %s1194_s27 = scalar_lea.vmem %s1301_s0, %s747_s24  ;;  %p1060_p13 = pneg %p1059_p12 }
  0x18   : > { %v1041_v2 = vld [vmem:[%s1194_s27] sm:$0xff]   ;;  %v1043_v4 = vld [vmem:[%s1194_s27 + $0x8] sm:$0xff]   ;;  %v1045_v6 = vld [vmem:[%s1194_s27 + $0x10] sm:$0xff]   ;;  %p1066_p2 = por %p1065_p1, %p1064_p0 }
  0x19   : > { %v1042_v3 = vld [vmem:[%s1194_s27 + $0x40] sm:$0xff]   ;;  %964 = vmatprep.mubr.msk.bf16.mxu0 %vm259_vm1, %v1041_v2  ;;  %v1044_v5 = vld [vmem:[%s1194_s27 + $0x48] sm:$0xff]   ;;  %v1046_v7 = vld [vmem:[%s1194_s27 + $0x50] sm:$0xff]  }
  0x1a   : > { %980 = vmatprep.mubr.msk.bf16.mxu1 %vm259_vm1, %v1042_v3  ;;  %965 = vmatmul.mubr.msk.bf16.vlgmr.msra.gmra.mrb[0].mxu0 %vm259_vm1, %v1043_v4  ;;  %v1047_v8 = vld [vmem:[%s1194_s27 + $0x18] sm:$0xff]   ;;  %v1049_v10 = vld [vmem:[%s1194_s27 + $0x20] sm:$0xff]   ;;  %v1051_v12 = vld [vmem:[%s1194_s27 + $0x28] sm:$0xff]   ;;  %p1067_p3 = pnand %p1066_p2, %p1060_p13 }
  0x1b   : > { %981 = vmatmul.mubr.msk.bf16.vlgmr.msra.gmra.mrb[0].mxu1 %vm259_vm1, %v1044_v5  ;;  %968 = vmatprep.mubr.msk.bf16.mxu0 %vm259_vm1, %v1045_v6  ;;  %v1048_v9 = vld [vmem:[%s1194_s27 + $0x58] sm:$0xff]   ;;  %v1050_v11 = vld [vmem:[%s1194_s27 + $0x60] sm:$0xff]   ;;  %v1052_v13 = vld [vmem:[%s1194_s27 + $0x68] sm:$0xff]  }
  0x1c   : > { %984 = vmatprep.mubr.msk.bf16.mxu1 %vm259_vm1, %v1046_v7  ;;  %v1053_v14 = vld [vmem:[%s1194_s27 + $0x30] sm:$0xff]   ;;  %v1055_v16 = vld [vmem:[%s1194_s27 + $0x38] sm:$0xff]  }
  0x1d   : > { %v1054_v15 = vld [vmem:[%s1194_s27 + $0x70] sm:$0xff]   ;;  %v1056_v17 = vld [vmem:[%s1194_s27 + $0x78] sm:$0xff]  }
  0x22   : > { %969 = vmatmul.mubr.msk.bf16.gmra.mrb[4].mxu0 %vm259_vm1, %v1047_v8 }
  0x23   : > { %985 = vmatmul.mubr.msk.bf16.gmra.mrb[4].mxu1 %vm259_vm1, %v1048_v9  ;;  %972 = vmatprep.mubr.msk.bf16.mxu0 %vm259_vm1, %v1049_v10 }
  0x24   : > { %988 = vmatprep.mubr.msk.bf16.mxu1 %vm259_vm1, %v1050_v11 }
  0x2a   : > { %973 = vmatmul.mubr.msk.bf16.gmra.mrb[8].mxu0 %vm259_vm1, %v1051_v12 }
  0x2b   : > { %989 = vmatmul.mubr.msk.bf16.gmra.mrb[8].mxu1 %vm259_vm1, %v1052_v13  ;;  %976 = vmatprep.mubr.msk.bf16.mxu0 %vm259_vm1, %v1053_v14 }
  0x2c   : > { %992 = vmatprep.mubr.msk.bf16.mxu1 %vm259_vm1, %v1054_v15 }
  0x32   : > { %977 = vmatmul.mubr.msk.bf16.gmra.mrb[12].mxu0 %vm259_vm1, %v1055_v16 }
  0x33   : > { %993 = vmatmul.mubr.msk.bf16.gmra.mrb[12].mxu1 %vm259_vm1, %v1056_v17 }
  0xed   : > { %v966_v18 = vpop.f32.mrb[0].mxu0 }
  0xee   : > { %v982_v19 = vpop.f32.mrb[0].mxu1  ;;  %v346_v20 = vpop.f32.mrb[1].mxu0  ;;  %v475_v23 = vmax.f32 %v966_v18, 0.0 }
  0xef   : > { %v410_v21 = vpop.f32.mrb[1].mxu1  ;;  %v967_v22 = vpop.f32.mrb[2].mxu0  ;;  %v491_v27 = vmax.f32 %v982_v19, 0.0  ;;  %v473_v28 = vmax.f32 %v346_v20, 0.0 }
  0xf0   : > { %v476_v24 = vmax.f32 %v967_v22, 0.0  ;;  %v983_v25 = vpop.f32.mrb[2].mxu1  ;;  %v349_v26 = vpop.f32.mrb[3].mxu0  ;;  %v489_v32 = vmax.f32 %v410_v21, 0.0 }
  0xf1   : > { %v492_v29 = vmax.f32 %v983_v25, 0.0  ;;  %v474_v30 = vmax.f32 %v349_v26, 0.0  ;;  %v413_v31 = vpop.f32.mrb[3].mxu1 }
  0xf2   : > { %v858_v33 = vpack.c.bf16 %v476_v24, %v475_v23  ;;  %v490_v34 = vmax.f32 %v413_v31, 0.0 }
  0xf3   : > { %v898_v35 = vpack.c.bf16 %v492_v29, %v491_v27  ;;  %v853_v36 = vpack.c.bf16 %v474_v30, %v473_v28 }
  0xf4   : > { %930 = vst [vmem:[%s1231_s30 + $0x8] sm:$0xff] %v858_v33   ;;  %v893_v37 = vpack.c.bf16 %v490_v34, %v489_v32 }
  0xf5   : > { %938 = vst [vmem:[%s1231_s30 + $0x48] sm:$0xff] %v898_v35   ;;  %854 = vst [vmem:[%s1231_s30] sm:$0xff] %v853_v36   ;;  %v970_v38 = vpop.f32.mrb[4].mxu0 }
  0xf6   : > { %937 = vst [vmem:[%s1231_s30 + $0x40] sm:$0xff] %v893_v37   ;;  %v986_v39 = vpop.f32.mrb[4].mxu1  ;;  %v362_v40 = vpop.f32.mrb[5].mxu0  ;;  %v479_v43 = vmax.f32 %v970_v38, 0.0 }
  0xf7   : > { %v426_v41 = vpop.f32.mrb[5].mxu1  ;;  %v971_v42 = vpop.f32.mrb[6].mxu0  ;;  %v495_v47 = vmax.f32 %v986_v39, 0.0  ;;  %v477_v48 = vmax.f32 %v362_v40, 0.0 }
  0xf8   : > { %v480_v44 = vmax.f32 %v971_v42, 0.0  ;;  %v987_v45 = vpop.f32.mrb[6].mxu1  ;;  %v365_v46 = vpop.f32.mrb[7].mxu0  ;;  %v493_v52 = vmax.f32 %v426_v41, 0.0 }
  0xf9   : > { %v496_v49 = vmax.f32 %v987_v45, 0.0  ;;  %v478_v50 = vmax.f32 %v365_v46, 0.0  ;;  %v429_v51 = vpop.f32.mrb[7].mxu1 }
  0xfa   : > { %v868_v53 = vpack.c.bf16 %v480_v44, %v479_v43  ;;  %v494_v54 = vmax.f32 %v429_v51, 0.0 }
  0xfb   : > { %v908_v55 = vpack.c.bf16 %v496_v49, %v495_v47  ;;  %v863_v56 = vpack.c.bf16 %v478_v50, %v477_v48 }
  0xfc   : > { %932 = vst [vmem:[%s1231_s30 + $0x18] sm:$0xff] %v868_v53   ;;  %v903_v57 = vpack.c.bf16 %v494_v54, %v493_v52 }
  0xfd   : > { %940 = vst [vmem:[%s1231_s30 + $0x58] sm:$0xff] %v908_v55   ;;  %931 = vst [vmem:[%s1231_s30 + $0x10] sm:$0xff] %v863_v56   ;;  %v974_v58 = vpop.f32.mrb[8].mxu0 }
  0xfe   : > { %939 = vst [vmem:[%s1231_s30 + $0x50] sm:$0xff] %v903_v57   ;;  %v990_v59 = vpop.f32.mrb[8].mxu1  ;;  %v378_v60 = vpop.f32.mrb[9].mxu0  ;;  %v483_v63 = vmax.f32 %v974_v58, 0.0 }
  0xff   : > { %v442_v61 = vpop.f32.mrb[9].mxu1  ;;  %v975_v62 = vpop.f32.mrb[10].mxu0  ;;  %v499_v3 = vmax.f32 %v990_v59, 0.0  ;;  %v481_v4 = vmax.f32 %v378_v60, 0.0 }
 0x100   : > { %v484_v0 = vmax.f32 %v975_v62, 0.0  ;;  %v991_v1 = vpop.f32.mrb[10].mxu1  ;;  %v381_v2 = vpop.f32.mrb[11].mxu0  ;;  %v497_v8 = vmax.f32 %v442_v61, 0.0 }
 0x101   : > { %v500_v5 = vmax.f32 %v991_v1, 0.0  ;;  %v482_v6 = vmax.f32 %v381_v2, 0.0  ;;  %v445_v7 = vpop.f32.mrb[11].mxu1 }
 0x102   : > { %v878_v9 = vpack.c.bf16 %v484_v0, %v483_v63  ;;  %v498_v10 = vmax.f32 %v445_v7, 0.0 }
 0x103   : > { %v918_v11 = vpack.c.bf16 %v500_v5, %v499_v3  ;;  %v873_v12 = vpack.c.bf16 %v482_v6, %v481_v4 }
 0x104   : > { %934 = vst [vmem:[%s1231_s30 + $0x28] sm:$0xff] %v878_v9   ;;  %v913_v13 = vpack.c.bf16 %v498_v10, %v497_v8 }
 0x105   : > { %942 = vst [vmem:[%s1231_s30 + $0x68] sm:$0xff] %v918_v11   ;;  %933 = vst [vmem:[%s1231_s30 + $0x20] sm:$0xff] %v873_v12   ;;  %v978_v14 = vpop.f32.mrb[12].mxu0 }
 0x106   : > { %941 = vst [vmem:[%s1231_s30 + $0x60] sm:$0xff] %v913_v13   ;;  %v994_v15 = vpop.f32.mrb[12].mxu1  ;;  %v394_v16 = vpop.f32.mrb[13].mxu0  ;;  %v487_v19 = vmax.f32 %v978_v14, 0.0 }
 0x107   : > { %v458_v17 = vpop.f32.mrb[13].mxu1  ;;  %v979_v18 = vpop.f32.mrb[14].mxu0  ;;  %v503_v23 = vmax.f32 %v994_v15, 0.0  ;;  %v485_v24 = vmax.f32 %v394_v16, 0.0 }
 0x108   : > { %v488_v20 = vmax.f32 %v979_v18, 0.0  ;;  %v995_v21 = vpop.f32.mrb[14].mxu1  ;;  %v397_v22 = vpop.f32.mrb[15].mxu0  ;;  %v501_v28 = vmax.f32 %v458_v17, 0.0 }
 0x109   : > { %v504_v25 = vmax.f32 %v995_v21, 0.0  ;;  %v486_v26 = vmax.f32 %v397_v22, 0.0  ;;  %v461_v27 = vpop.f32.mrb[15].mxu1 }
 0x10a   : > { %v888_v29 = vpack.c.bf16 %v488_v20, %v487_v19  ;;  %v502_v30 = vmax.f32 %v461_v27, 0.0 }
 0x10b   : > { %v928_v31 = vpack.c.bf16 %v504_v25, %v503_v23  ;;  %v883_v32 = vpack.c.bf16 %v486_v26, %v485_v24 }
 0x10c   : > { %936 = vst [vmem:[%s1231_s30 + $0x38] sm:$0xff] %v888_v29   ;;  %v923_v33 = vpack.c.bf16 %v502_v30, %v501_v28 }
 0x10d   : > { %944 = vst [vmem:[%s1231_s30 + $0x78] sm:$0xff] %v928_v31   ;;  %935 = vst [vmem:[%s1231_s30 + $0x30] sm:$0xff] %v883_v32  }
 0x10e   : > { %943 = vst [vmem:[%s1231_s30 + $0x70] sm:$0xff] %v923_v33  }
 0x10f   : > { %1070 = shalt.err (!%p1067_p3)
}
 0x110   : > { %s1071_s21 = scalar_lea.hbm %s1250_s7, 2048  ;;  %s1075_s24 = scalar_lea.hbm %s1303_s2, 4096 }
 0x111   : > { %p1072_p4 = scmp.ne.s32.totalorder %s1250_s7, %s1071_s21  ;;  %p1076_p9 = scmp.lt.u32.totalorder %s1250_s7, %s1303_s2 }
 0x112   : > { %p1077_p10 = scmp.lt.u32.totalorder %s1075_s24, %s1071_s21  ;;  %p1079_p12 = scmp.lt.u32.totalorder %s1071_s21, %s1250_s7 }
 0x113   : > { %p1073_p7 = pnand %p1072_p4, %p1177_p5 }
 0x114   : > { %p1078_p11 = por %p1077_p10, %p1076_p9 }
 0x115   : > { %p1074_p8 = pneg %p1073_p7 }
 0x116   : > { %p1080_p13 = por %p1079_p12, %p1078_p11 }
 0x118   : > { %p1081_p0 = pnand %p1080_p13, %p1074_p8 }
 0x11a   : > { %1084 = shalt.err (!%p1081_p0)
}
 0x11b   : > { %s1122_s27 = smov 64   ;;  %s1123_s28 = smov 4  }
 0x11c   : > { %1000 = dma.vmem_to_hbm [thread:$0]  (%p1177_p5), %s1252_s4, 2048, %s1250_s7, %s1260_s8, %s1122_s27, %s1122_s27, %s1123_s28  }
 0x11d PF: > { %p1006_p1 = scmp.ge.s32.totalorder %s1119_s12, 2  ;;  %s694_s29 = sand.u32 1, %s1107_s9  }
 0x11e   : > { %s695_s30 = scalar_lea.sflag [#allocation3], %s694_s29 }
 0x11f   : > { %p1003_p2 = pnand %p1006_p1, %p1181_p6 }
 0x121   : > { %1102 = dma.done.wait (!%p1003_p2), %s695_s30, 2048  }
 0x122   : > { %1104 = vsyncadd (!%p1003_p2), %s695_s30, 4294965248  ;;  %p12_p3 = scmp.ge.s32.totalorder %s1164_s15, 4   ;;  %s1306_s9 = smov %s1111_s10 }
 0x123   : > { %s1307_s10 = smov %s1115_s11  ;;  %s1308_s11 = smov %s1175_s18 }
 0x124   : > { %s1309_s12 = smov %s1164_s15  ;;  %14 = sbr.rel (!%p12_p3) target bundleno = 3 (0x3), region = 63 }
 0x12b   :  { %700 = vsyncpa [#allocation3], 1 }
 0x12c   :  { %702 = vsyncpa [#allocation3 + $0x1], 1 }

</bundles_post_ra>
